<compile_context>
chip_gen: v7x
topology: tpu7x:2x2x1
jax: 0.10.0
libtpu: 0.0.40
codegen_flags: <defaults>
</compile_context>

<pallas_src>
import functools
import math

import jax
import jax.numpy as jnp
from jax import lax
from jax.experimental import pallas as pl
from jax.experimental.pallas import tpu as pltpu


# Large finite negative used as the additive mask bias: keeps exp()/max()
# finite so the online softmax never produces NaN when an entire k-block is
# masked for some query row. For rows that are masked EVERYWHERE the output is
# a finite mean over V instead of PyTorch's NaN (degenerate case, documented).
_MASK_VALUE = -1e9


def _pick_block(s, target):
    """Largest block <= target that divides s (or the full dim)."""
    if s <= target:
        return s
    for b in (target, 256, 128, 64, 32, 16, 8):
        if b <= target and s % b == 0:
            return b
    return s  # fall back to a single full block (no tiling)


def _vmem_cap_bytes():
    """Generation-aware ceiling for the scoped VMEM limit."""
    cap = 64 << 20
    try:
        cap = int(pltpu.get_tpu_info().vmem_capacity_bytes)
    except Exception:
        pass
    # 64 MiB/TC parts (v7x): leave pipeline headroom; 128 MiB parts (v5e/v6e):
    # allow large tiles.
    return (48 << 20) if cap <= (64 << 20) else (100 << 20)


def _vmem_limit_bytes(buffer_bytes, headroom):
    # x2 for double-buffered pipeline copies, plus headroom for temporaries.
    total = 2 * int(sum(buffer_bytes)) + int(headroom)
    return int(min(max(total, 16 << 20), _vmem_cap_bytes()))


_DN_LAST = (((1,), (1,)), ((), ()))  # contract last dims of both operands


# ---------------------------------------------------------------------------
# Merged K/V projection kernel: k = xk @ Wk^T + bk ; v = xv @ Wv^T + bv
# (weights stay in PyTorch [out, in] layout; no transposes materialized)
# ---------------------------------------------------------------------------
def _kv_proj_kernel(xk_ref, xv_ref, wk_ref, bk_ref, wv_ref, bv_ref,
                    k_ref, v_ref):
    k = lax.dot_general(xk_ref[...], wk_ref[...], dimension_numbers=_DN_LAST,
                        preferred_element_type=jnp.float32)
    k_ref[...] = (k + bk_ref[...]).astype(k_ref.dtype)
    v = lax.dot_general(xv_ref[...], wv_ref[...], dimension_numbers=_DN_LAST,
                        preferred_element_type=jnp.float32)
    v_ref[...] = (v + bv_ref[...]).astype(v_ref.dtype)


def _project_kv(xk, xv, wk, bkb, wv, bvb, *, block_rows=256):
    s, d_in = xk.shape
    d_out = wk.shape[0]
    br = _pick_block(s, block_rows)
    grid = (s // br,)

    flops = 2 * 2 * s * d_in * d_out
    bytes_accessed = (2 * (2 * s * d_in)        # xk, xv (bf16)
                      + 2 * (2 * d_out * d_in)  # weights (bf16)
                      + 2 * (4 * d_out)         # biases (f32)
                      + 2 * (2 * s * d_out))    # k, v out (bf16)
    bufs = (2 * br * d_in, 2 * br * d_in,
            2 * d_out * d_in, 2 * d_out * d_in,
            4 * d_out, 4 * d_out,
            2 * br * d_out, 2 * br * d_out)
    vmem = _vmem_limit_bytes(bufs, headroom=4 << 20)

    return pl.pallas_call(
        _kv_proj_kernel,
        out_shape=(jax.ShapeDtypeStruct((s, d_out), jnp.bfloat16),
                   jax.ShapeDtypeStruct((s, d_out), jnp.bfloat16)),
        grid_spec=pltpu.PrefetchScalarGridSpec(
            num_scalar_prefetch=0,
            grid=grid,
            in_specs=[
                pl.BlockSpec((br, d_in), lambda i: (i, 0)),
                pl.BlockSpec((br, d_in), lambda i: (i, 0)),
                pl.BlockSpec((d_out, d_in), lambda i: (0, 0)),  # Wk resident
                pl.BlockSpec((1, d_out), lambda i: (0, 0)),
                pl.BlockSpec((d_out, d_in), lambda i: (0, 0)),  # Wv resident
                pl.BlockSpec((1, d_out), lambda i: (0, 0)),
            ],
            out_specs=[pl.BlockSpec((br, d_out), lambda i: (i, 0)),
                       pl.BlockSpec((br, d_out), lambda i: (i, 0))],
        ),
        compiler_params=pltpu.CompilerParams(
            dimension_semantics=("parallel",),
            vmem_limit_bytes=vmem,
        ),
        cost_estimate=pl.CostEstimate(flops=flops, transcendentals=0,
                                      bytes_accessed=int(bytes_accessed)),
    )(xk, xv, wk, bkb, wv, bvb)


# ---------------------------------------------------------------------------
# Flash-style attention kernel with fused Q projection (online softmax)
# ---------------------------------------------------------------------------
def _flash_step(bias_ref, xq_ref, wq_ref, bqb_ref, k_ref, v_ref, o_ref,
                q_sc, m_sc, l_sc, *, inv_scale):
    ki = pl.program_id(1)

    @pl.when(ki == 0)
    def _init():
        # Fused Q projection: (enc_q_tile @ W_q^T + b_q) * 1/sqrt(d); the small
        # matmul hides under the first K/V tile DMA.
        q = lax.dot_general(xq_ref[...], wq_ref[...],
                            dimension_numbers=_DN_LAST,
                            preferred_element_type=jnp.float32)
        q = (q + bqb_ref[...]) * jnp.float32(inv_scale)
        q_sc[...] = q.astype(q_sc.dtype)
        m_sc[...] = jnp.full_like(m_sc, -jnp.inf)
        l_sc[...] = jnp.zeros_like(l_sc)
        o_ref[...] = jnp.zeros_like(o_ref)   # o_ref is the accumulator

    # scores[i, j] = q[i, :] . k[j, :]  (q already carries 1/sqrt(d)); bf16
    # operands, f32 accumulation, no k.T materialized.
    s = lax.dot_general(q_sc[...], k_ref[...], dimension_numbers=_DN_LAST,
                        preferred_element_type=jnp.float32)
    if bias_ref is not None:
        s = s + bias_ref[...].astype(jnp.float32)   # additive 0 / -1e9 bias

    m_prev = m_sc[...]
    m_new = jnp.maximum(m_prev, jnp.max(s, axis=-1, keepdims=True))
    alpha = jnp.exp(m_prev - m_new)
    p = jnp.exp(s - m_new)
    l_sc[...] = alpha * l_sc[...] + jnp.sum(p, axis=-1, keepdims=True)
    pv = jnp.dot(p.astype(jnp.bfloat16), v_ref[...],
                 preferred_element_type=jnp.float32)
    o_ref[...] = alpha * o_ref[...] + pv
    m_sc[...] = m_new

    @pl.when(ki == pl.num_programs(1) - 1)
    def _finalize():
        inv_l = pl.reciprocal(l_sc[...], approx=True)   # EUP vrcp, ~free
        o_ref[...] = o_ref[...] * inv_l


def _flash_kernel(xq_ref, wq_ref, bqb_ref, k_ref, v_ref, o_ref,
                  q_sc, m_sc, l_sc, *, inv_scale):
    _flash_step(None, xq_ref, wq_ref, bqb_ref, k_ref, v_ref, o_ref,
                q_sc, m_sc, l_sc, inv_scale=inv_scale)


def _flash_kernel_masked(xq_ref, wq_ref, bqb_ref, k_ref, v_ref, bias_ref,
                         o_ref, q_sc, m_sc, l_sc, *, inv_scale):
    _flash_step(bias_ref, xq_ref, wq_ref, bqb_ref, k_ref, v_ref, o_ref,
                q_sc, m_sc, l_sc, inv_scale=inv_scale)


def _flash_attention(xq, wq, bqb, k, v, bias, *, inv_scale,
                     block_q=256, block_k=256):
    s_q, d = xq.shape
    s_k = k.shape[0]
    bq = _pick_block(s_q, block_q)
    bk = _pick_block(s_k, block_k)
    n_qb = s_q // bq
    grid = (n_qb, s_k // bk)

    in_specs = [
        pl.BlockSpec((bq, d), lambda qi, ki: (qi, 0)),   # enc_q tile (bf16)
        pl.BlockSpec((d, d), lambda qi, ki: (0, 0)),     # W_q resident (bf16)
        pl.BlockSpec((1, d), lambda qi, ki: (0, 0)),     # b_q resident (f32)
        pl.BlockSpec((bk, d), lambda qi, ki: (ki, 0)),   # k tile (bf16)
        pl.BlockSpec((bk, d), lambda qi, ki: (ki, 0)),   # v tile (bf16)
    ]
    args = [xq, wq, bqb, k, v]
    bias_bytes = 0
    if bias is None:
        kernel = functools.partial(_flash_kernel, inv_scale=inv_scale)
    else:
        kernel = functools.partial(_flash_kernel_masked, inv_scale=inv_scale)
        in_specs.append(pl.BlockSpec((bq, bk), lambda qi, ki: (qi, ki)))
        args.append(bias)
        bias_bytes = 2 * s_q * s_k  # bf16

    flops = 2 * s_q * d * d + 4 * s_q * s_k * d          # Qproj + QK^T + PV
    bytes_accessed = (2 * s_q * d + 2 * d * d + 4 * d     # enc_q, W_q, b_q
                      + n_qb * 2 * (2 * s_k * d)          # K,V re-read per q-blk
                      + bias_bytes
                      + 4 * s_q * d)                      # output (f32)
    bufs = [2 * bq * d, 2 * d * d, 4 * d, 2 * bk * d, 2 * bk * d,
            4 * bq * d,                       # out tile (f32 accumulator)
            2 * bq * d, 4 * bq, 4 * bq]       # q/m/l scratch
    if bias is not None:
        bufs.append(2 * bq * bk)
    headroom = 8 * bq * bk * 4 + (4 << 20)    # s / p f32 temporaries
    vmem = _vmem_limit_bytes(bufs, headroom)

    return pl.pallas_call(
        kernel,
        out_shape=jax.ShapeDtypeStruct((s_q, d), jnp.float32),
        grid_spec=pltpu.PrefetchScalarGridSpec(
            num_scalar_prefetch=0,
            grid=grid,
            in_specs=in_specs,
            out_specs=pl.BlockSpec((bq, d), lambda qi, ki: (qi, 0)),
            scratch_shapes=[
                pltpu.VMEM((bq, d), jnp.bfloat16),   # projected & scaled q
                pltpu.VMEM((bq, 1), jnp.float32),    # running max m
                pltpu.VMEM((bq, 1), jnp.float32),    # running denom l
            ],
        ),
        compiler_params=pltpu.CompilerParams(
            dimension_semantics=("parallel", "arbitrary"),
            vmem_limit_bytes=vmem,
        ),
        cost_estimate=pl.CostEstimate(flops=int(flops),
                                      transcendentals=int(2 * s_q * s_k),
                                      bytes_accessed=int(bytes_accessed)),
    )(*args)


# ---------------------------------------------------------------------------
# Public forward pass (matches the PyTorch module)
# ---------------------------------------------------------------------------
def attention_forward(enc_q, enc_k, enc_v, params, mask=None,
                      *, block_q=256, block_k=256):
    """params: W_q/W_k/W_v of shape [d_model, d_model] (PyTorch [out, in]),
    b_q/b_k/b_v of shape [d_model]."""
    d_model = enc_q.shape[-1]
    inv_scale = 1.0 / math.sqrt(float(d_model))     # fold 1/sqrt(d) into q

    # bf16 operands for the MXU (f32 accumulation + f32 softmax math inside).
    xq = enc_q.astype(jnp.bfloat16)
    xk = enc_k.astype(jnp.bfloat16)
    xv = enc_v.astype(jnp.bfloat16)
    wq = params["W_q"].astype(jnp.bfloat16)
    wk = params["W_k"].astype(jnp.bfloat16)
    wv = params["W_v"].astype(jnp.bfloat16)
    bqb = params["b_q"].astype(jnp.float32).reshape(1, d_model)
    bkb = params["b_k"].astype(jnp.float32).reshape(1, d_model)
    bvb = params["b_v"].astype(jnp.float32).reshape(1, d_model)

    k, v = _project_kv(xk, xv, wk, bkb, wv, bvb,
                       block_rows=max(block_k, 256))

    bias = None
    if mask is not None:
        # Additive bias (0 / -1e9): single add in the inner loop, bf16 traffic.
        bias = jnp.where(mask == 0, jnp.float32(_MASK_VALUE),
                         jnp.float32(0.0)).astype(jnp.bfloat16)

    return _flash_attention(xq, wq, bqb, k, v, bias, inv_scale=inv_scale,
                            block_q=block_q, block_k=block_k)


def _reference(enc_q, enc_k, enc_v, params, mask=None):
    d_model = enc_q.shape[-1]
    q = enc_q @ params["W_q"].T + params["b_q"]
    k = enc_k @ params["W_k"].T + params["b_k"]
    v = enc_v @ params["W_v"].T + params["b_v"]
    scores = (q @ k.T) / jnp.sqrt(jnp.float32(d_model))
    if mask is not None:
        scores = jnp.where(mask == 0, -jnp.inf, scores)
    attn = jax.nn.softmax(scores, axis=-1)
    return attn @ v


if __name__ == "__main__":
    d_model = 128   # small but (8,128)-aligned stand-in for the default 512

    key = jax.random.PRNGKey(0)
    ks = jax.random.split(key, 9)
    params = {
        "W_q": jax.random.normal(ks[0], (d_model, d_model), jnp.float32) * 0.05,
        "W_k": jax.random.normal(ks[1], (d_model, d_model), jnp.float32) * 0.05,
        "W_v": jax.random.normal(ks[2], (d_model, d_model), jnp.float32) * 0.05,
        "b_q": jax.random.normal(ks[3], (d_model,), jnp.float32) * 0.01,
        "b_k": jax.random.normal(ks[4], (d_model,), jnp.float32) * 0.01,
        "b_v": jax.random.normal(ks[5], (d_model,), jnp.float32) * 0.01,
    }

    def run_case(seq, use_mask, block_q=256, block_k=256):
        kq, kk, kv = jax.random.split(jax.random.fold_in(key, seq), 3)
        enc_q = jax.random.normal(kq, (seq, d_model), jnp.float32)
        enc_k = jax.random.normal(kk, (seq, d_model), jnp.float32)
        enc_v = jax.random.normal(kv, (seq, d_model), jnp.float32)
        mask = jnp.tril(jnp.ones((seq, seq), dtype=jnp.int32)) if use_mask else None
        out = attention_forward(enc_q, enc_k, enc_v, params, mask=mask,
                                block_q=block_q, block_k=block_k)
        jax.block_until_ready(out)
        ref = _reference(enc_q, enc_k, enc_v, params, mask=mask)
        # bf16 MXU operands + approx reciprocal => looser tolerance vs f32 ref.
        assert jnp.allclose(out, ref, atol=2e-2, rtol=2e-2), (
            f"mismatch seq={seq} mask={use_mask} bq={block_q} bk={block_k}")

    # Tiny shapes (single block each): unmasked and causal-masked paths.
    run_case(8, use_mask=False)
    run_case(8, use_mask=True)
    # 2x2 grid: online-softmax accumulation across k-blocks and the
    # fully-masked-block path of the causal mask.
    run_case(256, use_mask=False, block_q=128, block_k=128)
    run_case(256, use_mask=True, block_q=128, block_k=128)
    # Default large (256) tiles.
    run_case(256, use_mask=True)

    print("KERNEL_OK")
</pallas_src>

<mosaic_0001>
module attributes {stable_mosaic.version = 11 : i64} {
  func.func @_kv_proj_kernel(%arg0: i32, %arg1: memref<8x128xbf16, #tpu.memory_space<vmem>>, %arg2: memref<8x128xbf16, #tpu.memory_space<vmem>>, %arg3: memref<128x128xbf16, #tpu.memory_space<vmem>>, %arg4: memref<1x128xf32, #tpu.memory_space<vmem>>, %arg5: memref<128x128xbf16, #tpu.memory_space<vmem>>, %arg6: memref<1x128xf32, #tpu.memory_space<vmem>>, %arg7: memref<8x128xbf16, #tpu.memory_space<vmem>>, %arg8: memref<8x128xbf16, #tpu.memory_space<vmem>>) attributes {dimension_semantics = [#tpu.dimension_semantics<parallel>], iteration_bounds = array<i64: 1>, scalar_prefetch = 0 : i64, scratch_operands = 0 : i64, tpu.core_type = #tpu.core_type<tc>, window_params = [{transform_indices = @transform_0, window_bounds = array<i64: 8, 128>}, {transform_indices = @transform_1, window_bounds = array<i64: 8, 128>}, {pipeline_mode = #tpu.pipeline_mode<synchronous>, transform_indices = @transform_2, window_bounds = array<i64: 128, 128>}, {pipeline_mode = #tpu.pipeline_mode<synchronous>, transform_indices = @transform_3, window_bounds = array<i64: 1, 128>}, {pipeline_mode = #tpu.pipeline_mode<synchronous>, transform_indices = @transform_4, window_bounds = array<i64: 128, 128>}, {pipeline_mode = #tpu.pipeline_mode<synchronous>, transform_indices = @transform_5, window_bounds = array<i64: 1, 128>}, {transform_indices = @transform_6, window_bounds = array<i64: 8, 128>}, {transform_indices = @transform_7, window_bounds = array<i64: 8, 128>}]} {
    %c0 = arith.constant 0 : index
    %c0_0 = arith.constant 0 : index
    %0 = vector.load %arg1[%c0, %c0_0] : memref<8x128xbf16, #tpu.memory_space<vmem>>, vector<8x128xbf16>
    %c0_1 = arith.constant 0 : index
    %c0_2 = arith.constant 0 : index
    %1 = vector.load %arg3[%c0_1, %c0_2] : memref<128x128xbf16, #tpu.memory_space<vmem>>, vector<128x128xbf16>
    %cst = arith.constant dense<0.000000e+00> : vector<8x128xf32>
    %2 = tpu.matmul %0, %1, %cst {dimension_numbers = #tpu.dot_dimension_numbers<[1], [1], [0], [0], [0, 0, 1, 0], [], []>} : vector<8x128xbf16>, vector<128x128xbf16>, vector<8x128xf32> -> vector<8x128xf32>
    %c0_3 = arith.constant 0 : index
    %c0_4 = arith.constant 0 : index
    %3 = vector.load %arg4[%c0_3, %c0_4] : memref<1x128xf32, #tpu.memory_space<vmem>>, vector<1x128xf32>
    %4 = vector.broadcast %3 : vector<1x128xf32> to vector<8x128xf32>
    %5 = arith.addf %2, %4 : vector<8x128xf32>
    %6 = arith.truncf %5 : vector<8x128xf32> to vector<8x128xbf16>
    %c0_5 = arith.constant 0 : index
    %c0_6 = arith.constant 0 : index
    %7 = vector.load %arg7[%c0_5, %c0_6] : memref<8x128xbf16, #tpu.memory_space<vmem>>, vector<8x128xbf16>
    tpu.vector_store %arg7[%c0_5, %c0_6], %6 {strides = array<i32>} : memref<8x128xbf16, #tpu.memory_space<vmem>>, vector<8x128xbf16>,
    %c0_7 = arith.constant 0 : index
    %c0_8 = arith.constant 0 : index
    %8 = vector.load %arg2[%c0_7, %c0_8] : memref<8x128xbf16, #tpu.memory_space<vmem>>, vector<8x128xbf16>
    %c0_9 = arith.constant 0 : index
    %c0_10 = arith.constant 0 : index
    %9 = vector.load %arg5[%c0_9, %c0_10] : memref<128x128xbf16, #tpu.memory_space<vmem>>, vector<128x128xbf16>
    %cst_11 = arith.constant dense<0.000000e+00> : vector<8x128xf32>
    %10 = tpu.matmul %8, %9, %cst_11 {dimension_numbers = #tpu.dot_dimension_numbers<[1], [1], [0], [0], [0, 0, 1, 0], [], []>} : vector<8x128xbf16>, vector<128x128xbf16>, vector<8x128xf32> -> vector<8x128xf32>
    %c0_12 = arith.constant 0 : index
    %c0_13 = arith.constant 0 : index
    %11 = vector.load %arg6[%c0_12, %c0_13] : memref<1x128xf32, #tpu.memory_space<vmem>>, vector<1x128xf32>
    %12 = vector.broadcast %11 : vector<1x128xf32> to vector<8x128xf32>
    %13 = arith.addf %10, %12 : vector<8x128xf32>
    %14 = arith.truncf %13 : vector<8x128xf32> to vector<8x128xbf16>
    %c0_14 = arith.constant 0 : index
    %c0_15 = arith.constant 0 : index
    %15 = vector.load %arg8[%c0_14, %c0_15] : memref<8x128xbf16, #tpu.memory_space<vmem>>, vector<8x128xbf16>
    tpu.vector_store %arg8[%c0_14, %c0_15], %14 {strides = array<i32>} : memref<8x128xbf16, #tpu.memory_space<vmem>>, vector<8x128xbf16>,
    return
  }
  func.func @transform_0(%arg0: i32) -> (i32, i32) {
    %c0_i32 = arith.constant 0 : i32
    %c0_i32_0 = arith.constant 0 : i32
    return %arg0, %c0_i32 : i32, i32
  }
  func.func @transform_1(%arg0: i32) -> (i32, i32) {
    %c0_i32 = arith.constant 0 : i32
    %c0_i32_0 = arith.constant 0 : i32
    return %arg0, %c0_i32 : i32, i32
  }
  func.func @transform_2(%arg0: i32) -> (i32, i32) {
    %c0_i32 = arith.constant 0 : i32
    %c0_i32_0 = arith.constant 0 : i32
    %c0_i32_1 = arith.constant 0 : i32
    return %c0_i32, %c0_i32_0 : i32, i32
  }
  func.func @transform_3(%arg0: i32) -> (i32, i32) {
    %c0_i32 = arith.constant 0 : i32
    %c0_i32_0 = arith.constant 0 : i32
    %c0_i32_1 = arith.constant 0 : i32
    return %c0_i32, %c0_i32_0 : i32, i32
  }
  func.func @transform_4(%arg0: i32) -> (i32, i32) {
    %c0_i32 = arith.constant 0 : i32
    %c0_i32_0 = arith.constant 0 : i32
    %c0_i32_1 = arith.constant 0 : i32
    return %c0_i32, %c0_i32_0 : i32, i32
  }
  func.func @transform_5(%arg0: i32) -> (i32, i32) {
    %c0_i32 = arith.constant 0 : i32
    %c0_i32_0 = arith.constant 0 : i32
    %c0_i32_1 = arith.constant 0 : i32
    return %c0_i32, %c0_i32_0 : i32, i32
  }
  func.func @transform_6(%arg0: i32) -> (i32, i32) {
    %c0_i32 = arith.constant 0 : i32
    %c0_i32_0 = arith.constant 0 : i32
    return %arg0, %c0_i32 : i32, i32
  }
  func.func @transform_7(%arg0: i32) -> (i32, i32) {
    %c0_i32 = arith.constant 0 : i32
    %c0_i32_0 = arith.constant 0 : i32
    return %arg0, %c0_i32 : i32, i32
  }
}

</mosaic_0001>

<bundles_post_ra>
// kernel: tpu_custom_call.1
= control target key start
LH: loop header
LB: loop body
LE: loop exit
PB: predicated region body
PF: predicated region fallthrough
CT: control target
= control target key end

     0   :  { %13 = vsyncpa [#allocation3], 0  ;;  %s710_s0 = inlined_call_operand.hbm [shape: bf16[8,128], index: 0, kind: input, shape index: {}]   ;;  %s711_s1 = inlined_call_operand.hbm [shape: bf16[8,128], index: 1, kind: input, shape index: {}]   ;;  %s712_s2 = inlined_call_operand.hbm [shape: bf16[128,128], index: 2, kind: input, shape index: {}]   ;;  %s713_s3 = inlined_call_operand.vmem [shape: f32[1,128], index: 3, kind: input, shape index: {}]   ;;  %s714_s4 = inlined_call_operand.hbm [shape: bf16[128,128], index: 4, kind: input, shape index: {}]   ;;  %s715_s5 = inlined_call_operand.vmem [shape: f32[1,128], index: 5, kind: input, shape index: {}]   ;;  %s716_s6 = inlined_call_operand.hbm [shape: bf16[8,128], index: 6, kind: output, shape index: {0}]   ;;  %s717_s7 = inlined_call_operand.hbm [shape: bf16[8,128], index: 7, kind: output, shape index: {1}]  }
   0x1   :  { %14 = vsyncpa [#allocation6], 0 }
   0x2   :  { %15 = vsyncpa [#allocation9], 0 }
   0x3   :  { %16 = vsyncpa [#allocation4], 0 }
   0x4   :  { %17 = vsyncpa [#allocation12], 0  ;;  %s582_s24 = smov [#allocation5]   ;;  %s583_s26 = smov [#allocation2]  }
   0x5   :  { %s34_s25 = sshll.u32 %s582_s24, 4  ;;  %s24_s27 = sshll.u32 %s583_s26, 4  ;;  %s35_s25 = int_to_ptr.vmem [resolvable:$true] %s34_s25  ;;  %s25_s27 = int_to_ptr.vmem [resolvable:$true] %s24_s27 }
   0x6   :  { %s440_s30 = scalar_lea.hbm %s711_s1, 64 }
   0x7   :  { %p441_p0 = scmp.ne.s32.totalorder %s711_s1, %s440_s30  ;;  %p444_p1 = scmp.lt.u32.totalorder %s440_s30, %s711_s1 }
   0x9   :  { %p446_p2 = pnand %p444_p1, %p441_p0 }
   0xb   :  { %449 = shalt.err (!%p446_p2)
}
   0xc   :  { %s450_s12 = scalar_lea.vmem %s35_s25, 64  ;;  %p455_p4 = scmp.lt.s32.totalorder %s35_s25, %s35_s25 }
   0xd   :  { %p451_p3 = scmp.ne.s32.totalorder %s35_s25, %s450_s12  ;;  %p456_p5 = scmp.lt.s32.totalorder %s450_s12, %s450_s12 }
   0xf   :  { %p457_p6 = por %p456_p5, %p455_p4 }
  0x11   :  { %p458_p7 = pnand %p457_p6, %p451_p3 }
  0x13   :  { %461 = shalt.err (!%p458_p7)
}
  0x14   :  { %37 = dma.hbm_to_vmem [thread:$0]  %s711_s1, 64, %s35_s25, [#allocation6]  }
  0x15   :  { %s462_s17 = scalar_lea.hbm %s710_s0, 64 }
  0x16   :  { %p463_p8 = scmp.ne.s32.totalorder %s710_s0, %s462_s17  ;;  %p466_p9 = scmp.lt.u32.totalorder %s462_s17, %s710_s0 }
  0x18   :  { %p468_p10 = pnand %p466_p9, %p463_p8 }
  0x1a   :  { %471 = shalt.err (!%p468_p10)
}
  0x1b   :  { %s472_s22 = scalar_lea.vmem %s25_s27, 64  ;;  %p477_p12 = scmp.lt.s32.totalorder %s25_s27, %s25_s27 }
  0x1c   :  { %p473_p11 = scmp.ne.s32.totalorder %s25_s27, %s472_s22  ;;  %p478_p13 = scmp.lt.s32.totalorder %s472_s22, %s472_s22 }
  0x1e   :  { %p479_p0 = por %p478_p13, %p477_p12 }
  0x20   :  { %p480_p1 = pnand %p479_p0, %p473_p11 }
  0x22   :  { %483 = shalt.err (!%p480_p1)
}
  0x23   :  { %27 = dma.hbm_to_vmem [thread:$0]  %s710_s0, 64, %s25_s27, [#allocation3]  }
  0x24   :  { %s584_s24 = smov [#allocation7]   ;;  %s484_s29 = scalar_lea.hbm %s712_s2, 1024 }
  0x25   :  { %s43_s25 = sshll.u32 %s584_s24, 4  ;;  %p485_p2 = scmp.ne.s32.totalorder %s712_s2, %s484_s29  ;;  %s44_s25 = int_to_ptr.vmem [resolvable:$true] %s43_s25 }
  0x26   :  { %p488_p3 = scmp.lt.u32.totalorder %s484_s29, %s712_s2 }
  0x28   :  { %p490_p4 = pnand %p488_p3, %p485_p2 }
  0x2a   :  { %493 = shalt.err (!%p490_p4)
}
  0x2b   :  { %s494_s11 = scalar_lea.vmem %s44_s25, 1024  ;;  %p499_p6 = scmp.lt.s32.totalorder %s44_s25, %s44_s25 }
  0x2c   :  { %p495_p5 = scmp.ne.s32.totalorder %s44_s25, %s494_s11  ;;  %p500_p7 = scmp.lt.s32.totalorder %s494_s11, %s494_s11 }
  0x2e   :  { %p501_p8 = por %p500_p7, %p499_p6 }
  0x30   :  { %p502_p9 = pnand %p501_p8, %p495_p5 }
  0x32   :  { %505 = shalt.err (!%p502_p9)
}
  0x33   :  { %s585_s0 = smov 64   ;;  %s586_s27 = smov 4  }
  0x34   :  { %49 = dma.hbm_to_vmem [thread:$0]  %s712_s2, 1024, %s44_s25, [#allocation6], %s585_s0, %s585_s0, %s586_s27  }
  0x35   :  { %s587_s14 = smov [#allocation8]   ;;  %s506_s18 = scalar_lea.hbm %s714_s4, 1024 }
  0x36   :  { %s57_s15 = sshll.u32 %s587_s14, 4  ;;  %p507_p10 = scmp.ne.s32.totalorder %s714_s4, %s506_s18  ;;  %s58_s15 = int_to_ptr.vmem [resolvable:$true] %s57_s15 }
  0x37   :  { %p510_p11 = scmp.lt.u32.totalorder %s506_s18, %s714_s4 }
  0x39   :  { %p512_p12 = pnand %p510_p11, %p507_p10 }
  0x3b   :  { %515 = shalt.err (!%p512_p12)
}
  0x3c   :  { %s516_s1 = scalar_lea.vmem %s58_s15, 1024  ;;  %p521_p0 = scmp.lt.s32.totalorder %s58_s15, %s58_s15 }
  0x3d   :  { %p517_p13 = scmp.ne.s32.totalorder %s58_s15, %s516_s1  ;;  %p522_p1 = scmp.lt.s32.totalorder %s516_s1, %s516_s1 }
  0x3f   :  { %p523_p2 = por %p522_p1, %p521_p0 }
  0x41   :  { %p524_p3 = pnand %p523_p2, %p517_p13 }
  0x43   :  { %527 = shalt.err (!%p524_p3)
}
  0x44   :  { %63 = dma.hbm_to_vmem [thread:$0]  %s714_s4, 1024, %s58_s15, [#allocation9], %s585_s0, %s585_s0, %s586_s27  }
  0x45   :  { %572 = dma.done.wait [#allocation3], 64  }
  0x46   :  { %573 = vsyncadd [#allocation3], 4294967232 }
  0x47   :  { %574 = dma.done.wait [#allocation6], 1088  }
  0x48   :  { %575 = vsyncadd [#allocation6], 4294966208 }
  0x49   :  { %576 = dma.done.wait [#allocation9], 1024  }
  0x4a   :  { %577 = vsyncadd [#allocation9], 4294966272  ;;  %v588_v0 = vmov 0.0   ;;  %vm589_vm0 = vmmov 0   ;;  %v424_v1 = vld [vmem:[#allocation7] sm:$0xff]   ;;  %v426_v3 = vld [vmem:[#allocation7 + $0x8] sm:$0xff]  }
  0x4b   :  { %374 = vmatprep.subr.bf16.mxu0 %v588_v0  ;;  %394 = vmatprep.subr.bf16.mxu1 %v588_v0  ;;  %v425_v2 = vld [vmem:[#allocation8] sm:$0xff]   ;;  %v427_v4 = vld [vmem:[#allocation8 + $0x8] sm:$0xff]   ;;  %v428_v5 = vld [vmem:[#allocation7 + $0x10] sm:$0xff]   ;;  %s590_s28 = smov [#allocation10]   ;;  %s591_s30 = smov [#allocation11]  }
  0x4c   :  { %390 = vmatprep.mubr.msk.bf16.mxu0 %vm589_vm0, %v588_v0  ;;  %410 = vmatprep.mubr.msk.bf16.mxu1 %vm589_vm0, %v588_v0  ;;  %v429_v6 = vld [vmem:[#allocation8 + $0x10] sm:$0xff]   ;;  %v430_v7 = vld [vmem:[#allocation7 + $0x18] sm:$0xff]   ;;  %v432_v9 = vld [vmem:[#allocation7 + $0x20] sm:$0xff]   ;;  %s313_s29 = sshll.u32 %s590_s28, 4  ;;  %s323_s8 = sshll.u32 %s591_s30, 4  ;;  %s314_s29 = int_to_ptr.vmem [resolvable:$true] %s313_s29  ;;  %s324_s8 = int_to_ptr.vmem [resolvable:$true] %s323_s8 }
  0x4d   :  { %375 = vmatpush3.bf16.xpose.msra.mxu0 %v424_v1  ;;  %395 = vmatpush3.bf16.xpose.msra.mxu1 %v425_v2  ;;  %v431_v8 = vld [vmem:[#allocation8 + $0x18] sm:$0xff]   ;;  %v433_v10 = vld [vmem:[#allocation8 + $0x20] sm:$0xff]   ;;  %v434_v11 = vld [vmem:[#allocation7 + $0x28] sm:$0xff]   ;;  %p533_p5 = scmp.lt.s32.totalorder %s314_s29, %s314_s29 }
  0x4e   :  { %376 = vmatprep.subr.bf16.mxu0 %v588_v0  ;;  %396 = vmatprep.subr.bf16.mxu1 %v588_v0  ;;  %v435_v12 = vld [vmem:[#allocation8 + $0x28] sm:$0xff]   ;;  %v436_v13 = vld [vmem:[#allocation7 + $0x30] sm:$0xff]   ;;  %v438_v15 = vld [vmem:[#allocation7 + $0x38] sm:$0xff]  }
  0x4f   :  { %v437_v14 = vld [vmem:[#allocation8 + $0x30] sm:$0xff]   ;;  %v439_v16 = vld [vmem:[#allocation8 + $0x38] sm:$0xff]  }
  0x50   :  { %v79_v17 = vld [vmem:[#allocation2] sm:$0xf]  ;;  %v193_v18 = vld [vmem:[#allocation5] sm:$0xf] }
  0x51   :  { %v338_v19 = vld [vmem:[%s713_s3] ss:$0 sm:$0xff]  ;;  %s528_s3 = scalar_lea.vmem %s314_s29, 64 }
  0x52   :  { %v347_v20 = vld [vmem:[%s715_s5] ss:$0 sm:$0xff]  ;;  %p529_p4 = scmp.ne.s32.totalorder %s314_s29, %s528_s3  ;;  %p534_p6 = scmp.lt.s32.totalorder %s528_s3, %s528_s3 }
  0x54   :  { %p535_p7 = por %p534_p6, %p533_p5 }
  0x55   :  { %377 = vmatpush3.bf16.xpose.msra.mxu0 %v426_v3  ;;  %397 = vmatpush3.bf16.xpose.msra.mxu1 %v427_v4 }
  0x56   :  { %378 = vmatprep.subr.bf16.mxu0 %v588_v0  ;;  %398 = vmatprep.subr.bf16.mxu1 %v588_v0  ;;  %p536_p8 = pnand %p535_p7, %p529_p4 }
  0x5d   :  { %379 = vmatpush3.bf16.xpose.msra.mxu0 %v428_v5  ;;  %399 = vmatpush3.bf16.xpose.msra.mxu1 %v429_v6 }
  0x5e   :  { %380 = vmatprep.subr.bf16.mxu0 %v588_v0  ;;  %400 = vmatprep.subr.bf16.mxu1 %v588_v0 }
  0x65   :  { %381 = vmatpush3.bf16.xpose.msra.mxu0 %v430_v7  ;;  %401 = vmatpush3.bf16.xpose.msra.mxu1 %v431_v8 }
  0x66   :  { %382 = vmatprep.subr.bf16.mxu0 %v588_v0  ;;  %402 = vmatprep.subr.bf16.mxu1 %v588_v0 }
  0x6d   :  { %383 = vmatpush3.bf16.xpose.msra.mxu0 %v432_v9  ;;  %403 = vmatpush3.bf16.xpose.msra.mxu1 %v433_v10 }
  0x6e   :  { %384 = vmatprep.subr.bf16.mxu0 %v588_v0  ;;  %404 = vmatprep.subr.bf16.mxu1 %v588_v0 }
  0x75   :  { %385 = vmatpush3.bf16.xpose.msra.mxu0 %v434_v11  ;;  %405 = vmatpush3.bf16.xpose.msra.mxu1 %v435_v12 }
  0x76   :  { %386 = vmatprep.subr.bf16.mxu0 %v588_v0  ;;  %406 = vmatprep.subr.bf16.mxu1 %v588_v0 }
  0x7d   :  { %387 = vmatpush3.bf16.xpose.msra.mxu0 %v436_v13  ;;  %407 = vmatpush3.bf16.xpose.msra.mxu1 %v437_v14 }
  0x7e   :  { %388 = vmatprep.subr.bf16.mxu0 %v588_v0  ;;  %408 = vmatprep.subr.bf16.mxu1 %v588_v0 }
  0x85   :  { %389 = vmatpush3.bf16.xpose.msra.mxu0 %v438_v15  ;;  %409 = vmatpush3.bf16.xpose.msra.mxu1 %v439_v16 }
  0x8c   :  { %391 = vmatmul.mubr.bf16.vlgmr.msra.gmra.mrb[0].mxu0 %v79_v17  ;;  %411 = vmatmul.mubr.bf16.vlgmr.msra.gmra.mrb[0].mxu1 %v193_v18 }
 0x15f   :  { %v185_v21 = vpop.f32.mrb[0].mxu0  ;;  %v299_v23 = vpop.f32.mrb[0].mxu1 }
 0x160   :  { %v186_v22 = vadd.f32 %v338_v19, %v185_v21  ;;  %v392_v24 = vpop.f32.mrb[1].mxu0  ;;  %v300_v25 = vadd.f32 %v347_v20, %v299_v23  ;;  %v412_v26 = vpop.f32.mrb[1].mxu1 }
 0x161   :  { %v188_v27 = vpop.f32.mrb[2].mxu0  ;;  %v302_v29 = vpop.f32.mrb[2].mxu1 }
 0x162   :  { %v191_v28 = vpack.c.bf16 %v186_v22, %v186_v22  ;;  %v393_v30 = vpop.f32.mrb[3].mxu0  ;;  %v305_v31 = vpack.c.bf16 %v300_v25, %v300_v25  ;;  %v413_v32 = vpop.f32.mrb[3].mxu1 }
 0x164   :  { %192 = vst [vmem:[#allocation10] sm:$0xf] %v191_v28  ;;  %306 = vst [vmem:[#allocation11] sm:$0xf] %v305_v31 }
 0x165   :  { %539 = shalt.err (!%p536_p8)
}
 0x166   :  { %s540_s10 = scalar_lea.hbm %s716_s6, 64 }
 0x167   :  { %p541_p9 = scmp.ne.s32.totalorder %s716_s6, %s540_s10  ;;  %p544_p10 = scmp.lt.u32.totalorder %s540_s10, %s716_s6 }
 0x169   :  { %p546_p11 = pnand %p544_p10, %p541_p9 }
 0x16b   :  { %549 = shalt.err (!%p546_p11)
}
 0x16c   :  { %316 = dma.vmem_to_hbm [thread:$0]  %s314_s29, 64, %s716_s6, [#allocation4]  }
 0x16d   :  { %s550_s15 = scalar_lea.vmem %s324_s8, 64  ;;  %p555_p13 = scmp.lt.s32.totalorder %s324_s8, %s324_s8 }
 0x16e   :  { %p551_p12 = scmp.ne.s32.totalorder %s324_s8, %s550_s15  ;;  %p556_p0 = scmp.lt.s32.totalorder %s550_s15, %s550_s15 }
 0x170   :  { %p557_p1 = por %p556_p0, %p555_p13 }
 0x172   :  { %p558_p2 = pnand %p557_p1, %p551_p12 }
 0x174   :  { %561 = shalt.err (!%p558_p2)
}
 0x175   :  { %s562_s18 = scalar_lea.hbm %s717_s7, 64 }
 0x176   :  { %p563_p3 = scmp.ne.s32.totalorder %s717_s7, %s562_s18  ;;  %p566_p4 = scmp.lt.u32.totalorder %s562_s18, %s717_s7 }
 0x178   :  { %p568_p5 = pnand %p566_p4, %p563_p3 }
 0x17a   :  { %571 = shalt.err (!%p568_p5)
}
 0x17b   :  { %326 = dma.vmem_to_hbm [thread:$0]  %s324_s8, 64, %s717_s7, [#allocation12]  }
 0x17c   :  { %578 = dma.done.wait [#allocation4], 64  }
 0x17d   :  { %579 = vsyncadd [#allocation4], 4294967232 }
 0x17e   :  { %580 = dma.done.wait [#allocation12], 64  }
 0x17f   :  { %581 = vsyncadd [#allocation12], 4294967232 }
 0x180   :  { %333 = vsyncpa [#allocation3], 1 }
 0x181   :  { %334 = vsyncpa [#allocation6], 1 }
 0x182   :  { %335 = vsyncpa [#allocation9], 1 }
 0x183   :  { %336 = vsyncpa [#allocation4], 1 }
 0x184   :  { %337 = vsyncpa [#allocation12], 1 }

</bundles_post_ra>
